<compile_context>
chip_gen: v7x
topology: tpu7x:2x2x1
jax: 0.10.0
libtpu: 0.0.40
codegen_flags: <defaults>
</compile_context>

<pallas_src>
import functools

import jax
import jax.numpy as jnp
from jax import lax
from jax.experimental import pallas as pl
from jax.experimental.pallas import tpu as pltpu


def _round_up(v, m):
    return ((v + m - 1) // m) * m


def _flat_geom(N, H, W):
    """Padded-flat layout constants for an (N, C, H, W) state."""
    Hp, Wp = H + 2, W + 2          # SAME-padded spatial extent
    S = Hp * Wp                    # padded positions per image
    M = N * S                      # real padded positions, whole batch
    MP = _round_up(M, 128)         # lane-dense body extent (unmasked stores)
    HALO = Wp + 1                  # max |lane shift| of a 3x3 tap in flat coords
    PAD_L = _round_up(HALO, 128)   # left margin, keeps the body lane-aligned
    TRAIL = _round_up(HALO, 128)   # right margin (keeps L a multiple of 128)
    L = PAD_L + MP + TRAIL         # total flat width carried by the solver
    assert PAD_L >= HALO and TRAIL >= HALO          # tap shifts stay in bounds
    assert MP % 128 == 0 and L % 128 == 0           # unmasked stores everywhere
    return Hp, Wp, S, M, MP, PAD_L, TRAIL, L


# ---------------- layout conversion (call ONCE, outside the ODE loop) -----------
def nchw_to_flat(x_nchw):
    """NCHW f32 -> padded-flat (C, L) f32 solver/kernel layout.
    Invariant: the padding ring, the MP-M tail lanes and both margins are zero."""
    N, C, H, W = x_nchw.shape
    _, _, _, M, MP, PAD_L, TRAIL, _ = _flat_geom(N, H, W)
    xt = jnp.transpose(x_nchw, (1, 0, 2, 3))                    # (C, N, H, W)
    xp = jnp.pad(xt, ((0, 0), (0, 0), (1, 1), (1, 1)))          # (C, N, Hp, Wp)
    return jnp.pad(xp.reshape(C, M), ((0, 0), (PAD_L, (MP - M) + TRAIL)))


def flat_to_nchw(x_flat, N, C, H, W):
    Hp, Wp, _, M, _, PAD_L, _, _ = _flat_geom(N, H, W)
    body = x_flat[:, PAD_L:PAD_L + M].reshape(C, N, Hp, Wp)
    return jnp.transpose(body[:, :, 1:H + 1, 1:W + 1], (1, 0, 2, 3))


# ---------------- fused conv -> ReLU -> conv Pallas kernel ----------------------
def _shl_fused_flat(x_flat, w1, w2, N, C, H, W):
    """conv3x3(C->Ch) -> ReLU -> conv3x3(Ch->C), SAME padding, no bias, done in
    the padded-flat layout in ONE Pallas invocation for the whole batch.
      x_flat: (C, L)  f32  state (zero ring / margins / tail)
      w1:     (Ch, 9*C)  bf16  hidden weights, tap-major columns (both branches)
      w2:     (C, 9*Ch)  bf16  visible weights, tap-major, coefficients folded in
    Returns (C, L) f32 in the SAME layout (ring / margins / tail zero)."""
    Hp, Wp, S, M, MP, PAD_L, TRAIL, L = _flat_geom(N, H, W)
    Ch = w1.shape[0]
    taps = [(dy, dx) for dy in range(3) for dx in range(3)]

    # Interior mask over the lane-dense body (compile-time constant under jit):
    # 1.0 at real pixels, 0.0 on the padding ring and on the MP-M tail lanes.
    yy = jnp.arange(S, dtype=jnp.int32) // Wp
    xx = jnp.arange(S, dtype=jnp.int32) % Wp
    inter = ((yy >= 1) & (yy <= H) & (xx >= 1) & (xx <= W)).astype(jnp.float32)
    mask = jnp.concatenate(
        [jnp.tile(inter, (N,)), jnp.zeros((MP - M,), jnp.float32)]).reshape(1, MP)

    def kernel(x_ref, w1_ref, w2_ref, mask_ref, out_ref,
               xb_ref, h_ref, p1_ref, p2_ref):
        # Single tiny cast of the f32 state to bf16 (MXU operand dtype).
        xb_ref[...] = x_ref[...].astype(jnp.bfloat16)

        # ---- conv1: im2col (K = 9*C) from 9 lane-shifted views, one dot ----
        # In padded-flat coordinates every 3x3 tap is a constant lane offset.
        for ti, (dy, dx) in enumerate(taps):
            off = PAD_L + (dy - 1) * Wp + (dx - 1)
            p1_ref[ti * C:(ti + 1) * C, :] = xb_ref[:, off:off + MP]
        h = jnp.dot(w1_ref[...], p1_ref[...],
                    preferred_element_type=jnp.float32)          # (Ch, MP) f32
        # ReLU + zero ring/tail (= SAME zero-padding for conv2); f32 VPU math.
        h = jnp.maximum(h, 0.0) * mask_ref[...]

        # ---- margin-extended hidden buffer (bf16, all stores lane-aligned) ----
        h_ref[:, :PAD_L] = jnp.zeros((Ch, PAD_L), jnp.bfloat16)
        h_ref[:, PAD_L + MP:] = jnp.zeros((Ch, TRAIL), jnp.bfloat16)
        h_ref[:, PAD_L:PAD_L + MP] = h.astype(jnp.bfloat16)      # single cast of h

        # ---- conv2: im2col (K = 9*Ch), one dot ----
        # Ch = 16 rows per tap == one packed bf16 sublane tile -> aligned stores.
        for ti, (dy, dx) in enumerate(taps):
            off = PAD_L + (dy - 1) * Wp + (dx - 1)
            p2_ref[ti * Ch:(ti + 1) * Ch, :] = h_ref[:, off:off + MP]
        out = jnp.dot(w2_ref[...], p2_ref[...],
                      preferred_element_type=jnp.float32)        # (C, MP) f32
        out = out * mask_ref[...]                                # keep ring/tail zero

        # Write back in the carried padded-flat layout (zero margins).
        out_ref[:, :PAD_L] = jnp.zeros((C, PAD_L), jnp.float32)
        out_ref[:, PAD_L + MP:] = jnp.zeros((C, TRAIL), jnp.float32)
        out_ref[:, PAD_L:PAD_L + MP] = out

    return pl.pallas_call(
        kernel,
        out_shape=jax.ShapeDtypeStruct((C, L), jnp.float32),
        grid=(1,),
        in_specs=[
            pl.BlockSpec((C, L), lambda i: (0, 0)),          # state, padded flat
            pl.BlockSpec((Ch, 9 * C), lambda i: (0, 0)),     # hidden weights (bf16)
            pl.BlockSpec((C, 9 * Ch), lambda i: (0, 0)),     # visible weights (bf16)
            pl.BlockSpec((1, MP), lambda i: (0, 0)),         # interior mask
        ],
        out_specs=pl.BlockSpec((C, L), lambda i: (0, 0)),
        scratch_shapes=[
            pltpu.VMEM((C, L), jnp.bfloat16),                # bf16 copy of state
            pltpu.VMEM((Ch, L), jnp.bfloat16),               # margin-extended hidden
            pltpu.VMEM((9 * C, MP), jnp.bfloat16),           # im2col patches, conv1
            pltpu.VMEM((9 * Ch, MP), jnp.bfloat16),          # im2col patches, conv2
        ],
        compiler_params=pltpu.CompilerParams(dimension_semantics=("arbitrary",)),
    )(x_flat, w1, w2, mask)


# ---------------- weight prep (hoisted, once) -----------------------------------
def _hidden_to_2d_bf16(w_oihw):
    """(Cint, C, 3, 3) -> tap-major (Cint, 9*C) bf16 for the MXU."""
    o, i, kh, kw = w_oihw.shape
    return jnp.transpose(w_oihw, (0, 2, 3, 1)).reshape(o, kh * kw * i).astype(jnp.bfloat16)


def _visible_to_ohwi(w_oihw):
    """(C, Cint, 3, 3) -> (C, 3, 3, Cint) f32; branch concat + coefficient scale
    happen per call so the interpolation stays in f32 before the bf16 cast."""
    return jnp.transpose(w_oihw, (0, 2, 3, 1)).astype(jnp.float32)


def prepare_params(params):
    """Precompute MXU-ready weight layouts once (outside the ODE loop)."""
    return {
        "hidden2d": [_hidden_to_2d_bf16(w) for w in params["hidden"]],
        "visible_ohwi": [_visible_to_ohwi(w) for w in params["visible"]],
    }


# ---------------- forward (matches SHL_ODEfunc.forward semantics) ---------------
@functools.partial(jax.jit, static_argnums=(0,))
def _forward_flat_jit(dims, x_flat, w1a, w1b, wv_a, wv_b, coef):
    N, C, H, W = dims
    # Branch fusion: hidden weights stacked along Cout; interpolation
    # coefficients folded into the visible weights (concat along Cin in OHWI so
    # the column order matches p2's tap-major row order), one bf16 cast.
    w1 = jnp.concatenate([w1a, w1b], axis=0)                         # (2*Cint, 9*C) bf16
    wv = jnp.concatenate([coef[0] * wv_a, coef[1] * wv_b], axis=-1)  # (C, 3, 3, 2*Cint)
    w2 = wv.reshape(C, -1).astype(jnp.bfloat16)                      # (C, 9*2*Cint) bf16
    return _shl_fused_flat(x_flat, w1, w2, N, C, H, W)


def shl_forward_flat(t, x_flat, params2d, num_steps, dims):
    """SHL_ODEfunc.forward(t, x) in the padded-flat solver layout.
    NOTE: t must be a concrete Python float (k = int(t*num_steps), as in the
    PyTorch module); if t comes from accumulated solver time, consider adding a
    small epsilon before flooring."""
    k = int(t * num_steps)
    if k < num_steps:
        ka, kb = k, k + 1
        c1 = 1.0 - t * num_steps + k
        c2 = t * num_steps - k
    else:                              # k == num_steps: single branch, coef (1, 0)
        ka = kb = k
        c1, c2 = 1.0, 0.0
    coef = jnp.array([c1, c2], jnp.float32)
    return _forward_flat_jit(dims, x_flat,
                             params2d["hidden2d"][ka], params2d["hidden2d"][kb],
                             params2d["visible_ohwi"][ka], params2d["visible_ohwi"][kb],
                             coef)


def shl_odefunc_forward(t, x_nchw, params2d, num_steps):
    """Convenience NCHW entry point.  Inside a solver loop use nchw_to_flat /
    shl_forward_flat / flat_to_nchw so the layout conversion is hoisted."""
    N, C, H, W = x_nchw.shape
    out_flat = shl_forward_flat(t, nchw_to_flat(x_nchw), params2d, num_steps,
                                (N, C, H, W))
    return flat_to_nchw(out_flat, N, C, H, W)


# ---------------- pure-JAX reference (correctness check) ------------------------
def _ref_conv(x_nchw, w_oihw):
    return lax.conv_general_dilated(
        x_nchw, w_oihw, window_strides=(1, 1), padding="SAME",
        dimension_numbers=("NCHW", "OIHW", "NCHW"))


def ref_forward(t, x, params, num_steps):
    k = int(t * num_steps)

    def branch(i):
        h = _ref_conv(x, params["hidden"][i])
        return _ref_conv(jnp.maximum(h, 0.0), params["visible"][i])

    if k < num_steps:
        return (1 - t * num_steps + k) * branch(k) + (t * num_steps - k) * branch(k + 1)
    return branch(k)


if __name__ == "__main__":
    # Module config: SHL_ODEfunc(dim=4, dim_int=8, num_steps=4)
    dim, dim_int, num_steps = 4, 8, 4
    N, H, W = 2, 16, 16

    key = jax.random.PRNGKey(0)
    keys = jax.random.split(key, 2 * (num_steps + 1) + 1)
    # zero_init=True in the reference module would zero all visible weights
    # (output identically 0); use nonzero init so the compute path is exercised.
    params = {"hidden": [], "visible": []}
    for i in range(num_steps + 1):
        params["hidden"].append(
            0.1 * jax.random.normal(keys[2 * i], (dim_int, dim, 3, 3), jnp.float32))
        params["visible"].append(
            0.1 * jax.random.normal(keys[2 * i + 1], (dim, dim_int, 3, 3), jnp.float32))
    x = jax.random.normal(keys[-1], (N, dim, H, W), jnp.float32)

    params2d = prepare_params(params)          # MXU weight layouts, hoisted (once)
    dims = (N, dim, H, W)

    # --- single-evaluation checks: t=0.3 -> two-branch interp (k=1); t=1.0 -> k==num_steps
    for t in (0.3, 1.0):
        out = jax.block_until_ready(shl_odefunc_forward(t, x, params2d, num_steps))
        ref = ref_forward(t, x, params, num_steps)
        assert out.shape == (N, dim, H, W)
        err = float(jnp.max(jnp.abs(out - ref)))
        # bf16 MXU operands with f32 accumulation -> tolerance reflects bf16 rounding.
        assert jnp.allclose(out, ref, rtol=3e-2, atol=3e-2), \
            f"mismatch at t={t}: max abs err {err}"

    # --- solver-style usage: state carried in the padded-flat layout, so the
    #     NCHW <-> flat conversion happens exactly once, outside the loop ------
    dt = 1.0 / num_steps
    xf = nchw_to_flat(x)                       # once, before the loop
    xr = x
    for i in range(num_steps):                 # explicit Euler demo
        t = i * dt
        xf = xf + dt * shl_forward_flat(t, xf, params2d, num_steps, dims)
        xr = xr + dt * ref_forward(t, xr, params, num_steps)
    x_end = jax.block_until_ready(flat_to_nchw(xf, N, dim, H, W))   # once, after
    err = float(jnp.max(jnp.abs(x_end - xr)))
    assert jnp.allclose(x_end, xr, rtol=1e-1, atol=1e-1), \
        f"Euler trajectory mismatch: max abs err {err}"

    print("KERNEL_OK")
</pallas_src>

<mosaic_0001>
module attributes {stable_mosaic.version = 11 : i64} {
  func.func @kernel(%arg0: i32, %arg1: memref<4x1024xf32, #tpu.memory_space<vmem>>, %arg2: memref<16x36xbf16, #tpu.memory_space<vmem>>, %arg3: memref<4x144xbf16, #tpu.memory_space<vmem>>, %arg4: memref<1x768xf32, #tpu.memory_space<vmem>>, %arg5: memref<4x1024xf32, #tpu.memory_space<vmem>>, %arg6: memref<4x1024xbf16, #tpu.memory_space<vmem>>, %arg7: memref<16x1024xbf16, #tpu.memory_space<vmem>>, %arg8: memref<36x768xbf16, #tpu.memory_space<vmem>>, %arg9: memref<144x768xbf16, #tpu.memory_space<vmem>>) attributes {dimension_semantics = [#tpu.dimension_semantics<arbitrary>], iteration_bounds = array<i64: 1>, scalar_prefetch = 0 : i64, scratch_operands = 4 : i64, tpu.core_type = #tpu.core_type<tc>, window_params = [{pipeline_mode = #tpu.pipeline_mode<synchronous>, transform_indices = @transform_0, window_bounds = array<i64: 4, 1024>}, {pipeline_mode = #tpu.pipeline_mode<synchronous>, transform_indices = @transform_1, window_bounds = array<i64: 16, 36>}, {pipeline_mode = #tpu.pipeline_mode<synchronous>, transform_indices = @transform_2, window_bounds = array<i64: 4, 144>}, {pipeline_mode = #tpu.pipeline_mode<synchronous>, transform_indices = @transform_3, window_bounds = array<i64: 1, 768>}, {pipeline_mode = #tpu.pipeline_mode<synchronous>, transform_indices = @transform_4, window_bounds = array<i64: 4, 1024>}]} {
    %c0 = arith.constant 0 : index
    %c0_0 = arith.constant 0 : index
    %0 = vector.load %arg1[%c0, %c0_0] : memref<4x1024xf32, #tpu.memory_space<vmem>>, vector<4x1024xf32>
    %1 = arith.truncf %0 : vector<4x1024xf32> to vector<4x1024xbf16>
    %c0_1 = arith.constant 0 : index
    %c0_2 = arith.constant 0 : index
    %2 = vector.load %arg6[%c0_1, %c0_2] : memref<4x1024xbf16, #tpu.memory_space<vmem>>, vector<4x1024xbf16>
    tpu.vector_store %arg6[%c0_1, %c0_2], %1 {strides = array<i32>} : memref<4x1024xbf16, #tpu.memory_space<vmem>>, vector<4x1024xbf16>,
    %c0_3 = arith.constant 0 : index
    %c109 = arith.constant 109 : index
    %3 = vector.load %arg6[%c0_3, %c109] : memref<4x1024xbf16, #tpu.memory_space<vmem>>, vector<4x768xbf16>
    %c0_4 = arith.constant 0 : index
    %c0_5 = arith.constant 0 : index
    %4 = vector.load %arg8[%c0_4, %c0_5] : memref<36x768xbf16, #tpu.memory_space<vmem>>, vector<4x768xbf16>
    tpu.vector_store %arg8[%c0_4, %c0_5], %3 {strides = array<i32>} : memref<36x768xbf16, #tpu.memory_space<vmem>>, vector<4x768xbf16>,
    %c0_6 = arith.constant 0 : index
    %c110 = arith.constant 110 : index
    %5 = vector.load %arg6[%c0_6, %c110] : memref<4x1024xbf16, #tpu.memory_space<vmem>>, vector<4x768xbf16>
    %c4 = arith.constant 4 : index
    %c0_7 = arith.constant 0 : index
    %6 = vector.load %arg8[%c4, %c0_7] : memref<36x768xbf16, #tpu.memory_space<vmem>>, vector<4x768xbf16>
    tpu.vector_store %arg8[%c4, %c0_7], %5 {strides = array<i32>} : memref<36x768xbf16, #tpu.memory_space<vmem>>, vector<4x768xbf16>,
    %c0_8 = arith.constant 0 : index
    %c111 = arith.constant 111 : index
    %7 = vector.load %arg6[%c0_8, %c111] : memref<4x1024xbf16, #tpu.memory_space<vmem>>, vector<4x768xbf16>
    %c8 = arith.constant 8 : index
    %c0_9 = arith.constant 0 : index
    %8 = vector.load %arg8[%c8, %c0_9] : memref<36x768xbf16, #tpu.memory_space<vmem>>, vector<4x768xbf16>
    tpu.vector_store %arg8[%c8, %c0_9], %7 {strides = array<i32>} : memref<36x768xbf16, #tpu.memory_space<vmem>>, vector<4x768xbf16>,
    %c0_10 = arith.constant 0 : index
    %c127 = arith.constant 127 : index
    %9 = vector.load %arg6[%c0_10, %c127] : memref<4x1024xbf16, #tpu.memory_space<vmem>>, vector<4x768xbf16>
    %c12 = arith.constant 12 : index
    %c0_11 = arith.constant 0 : index
    %10 = vector.load %arg8[%c12, %c0_11] : memref<36x768xbf16, #tpu.memory_space<vmem>>, vector<4x768xbf16>
    tpu.vector_store %arg8[%c12, %c0_11], %9 {strides = array<i32>} : memref<36x768xbf16, #tpu.memory_space<vmem>>, vector<4x768xbf16>,
    %c0_12 = arith.constant 0 : index
    %c128 = arith.constant 128 : index
    %11 = vector.load %arg6[%c0_12, %c128] : memref<4x1024xbf16, #tpu.memory_space<vmem>>, vector<4x768xbf16>
    %c16 = arith.constant 16 : index
    %c0_13 = arith.constant 0 : index
    %12 = vector.load %arg8[%c16, %c0_13] : memref<36x768xbf16, #tpu.memory_space<vmem>>, vector<4x768xbf16>
    tpu.vector_store %arg8[%c16, %c0_13], %11 {strides = array<i32>} : memref<36x768xbf16, #tpu.memory_space<vmem>>, vector<4x768xbf16>,
    %c0_14 = arith.constant 0 : index
    %c129 = arith.constant 129 : index
    %13 = vector.load %arg6[%c0_14, %c129] : memref<4x1024xbf16, #tpu.memory_space<vmem>>, vector<4x768xbf16>
    %c20 = arith.constant 20 : index
    %c0_15 = arith.constant 0 : index
    %14 = vector.load %arg8[%c20, %c0_15] : memref<36x768xbf16, #tpu.memory_space<vmem>>, vector<4x768xbf16>
    tpu.vector_store %arg8[%c20, %c0_15], %13 {strides = array<i32>} : memref<36x768xbf16, #tpu.memory_space<vmem>>, vector<4x768xbf16>,
    %c0_16 = arith.constant 0 : index
    %c145 = arith.constant 145 : index
    %15 = vector.load %arg6[%c0_16, %c145] : memref<4x1024xbf16, #tpu.memory_space<vmem>>, vector<4x768xbf16>
    %c24 = arith.constant 24 : index
    %c0_17 = arith.constant 0 : index
    %16 = vector.load %arg8[%c24, %c0_17] : memref<36x768xbf16, #tpu.memory_space<vmem>>, vector<4x768xbf16>
    tpu.vector_store %arg8[%c24, %c0_17], %15 {strides = array<i32>} : memref<36x768xbf16, #tpu.memory_space<vmem>>, vector<4x768xbf16>,
    %c0_18 = arith.constant 0 : index
    %c146 = arith.constant 146 : index
    %17 = vector.load %arg6[%c0_18, %c146] : memref<4x1024xbf16, #tpu.memory_space<vmem>>, vector<4x768xbf16>
    %c28 = arith.constant 28 : index
    %c0_19 = arith.constant 0 : index
    %18 = vector.load %arg8[%c28, %c0_19] : memref<36x768xbf16, #tpu.memory_space<vmem>>, vector<4x768xbf16>
    tpu.vector_store %arg8[%c28, %c0_19], %17 {strides = array<i32>} : memref<36x768xbf16, #tpu.memory_space<vmem>>, vector<4x768xbf16>,
    %c0_20 = arith.constant 0 : index
    %c147 = arith.constant 147 : index
    %19 = vector.load %arg6[%c0_20, %c147] : memref<4x1024xbf16, #tpu.memory_space<vmem>>, vector<4x768xbf16>
    %c32 = arith.constant 32 : index
    %c0_21 = arith.constant 0 : index
    %20 = vector.load %arg8[%c32, %c0_21] : memref<36x768xbf16, #tpu.memory_space<vmem>>, vector<4x768xbf16>
    tpu.vector_store %arg8[%c32, %c0_21], %19 {strides = array<i32>} : memref<36x768xbf16, #tpu.memory_space<vmem>>, vector<4x768xbf16>,
    %c0_22 = arith.constant 0 : index
    %c0_23 = arith.constant 0 : index
    %21 = vector.load %arg2[%c0_22, %c0_23] : memref<16x36xbf16, #tpu.memory_space<vmem>>, vector<16x36xbf16>
    %c0_24 = arith.constant 0 : index
    %c0_25 = arith.constant 0 : index
    %22 = vector.load %arg8[%c0_24, %c0_25] : memref<36x768xbf16, #tpu.memory_space<vmem>>, vector<36x768xbf16>
    %cst = arith.constant dense<0.000000e+00> : vector<16x768xf32>
    %23 = tpu.matmul %21, %22, %cst {dimension_numbers = #tpu.dot_dimension_numbers<[1], [0], [0], [1], [0, 0, 1, 1], [], []>} : vector<16x36xbf16>, vector<36x768xbf16>, vector<16x768xf32> -> vector<16x768xf32>
    %cst_26 = arith.constant 0.000000e+00 : f32
    %24 = vector.broadcast %cst_26 : f32 to vector<16x768xf32>
    %25 = arith.maximumf %23, %24 : vector<16x768xf32>
    %c0_27 = arith.constant 0 : index
    %c0_28 = arith.constant 0 : index
    %26 = vector.load %arg4[%c0_27, %c0_28] : memref<1x768xf32, #tpu.memory_space<vmem>>, vector<1x768xf32>
    %27 = vector.broadcast %26 : vector<1x768xf32> to vector<16x768xf32>
    %28 = arith.mulf %25, %27 : vector<16x768xf32>
    %cst_29 = arith.constant 0.000000e+00 : bf16
    %29 = vector.broadcast %cst_29 : bf16 to vector<16x128xbf16>
    %c0_30 = arith.constant 0 : index
    %c0_31 = arith.constant 0 : index
    %30 = vector.load %arg7[%c0_30, %c0_31] : memref<16x1024xbf16, #tpu.memory_space<vmem>>, vector<16x128xbf16>
    tpu.vector_store %arg7[%c0_30, %c0_31], %29 {strides = array<i32>} : memref<16x1024xbf16, #tpu.memory_space<vmem>>, vector<16x128xbf16>,
    %cst_32 = arith.constant 0.000000e+00 : bf16
    %31 = vector.broadcast %cst_32 : bf16 to vector<16x128xbf16>
    %c0_33 = arith.constant 0 : index
    %c896 = arith.constant 896 : index
    %32 = vector.load %arg7[%c0_33, %c896] : memref<16x1024xbf16, #tpu.memory_space<vmem>>, vector<16x128xbf16>
    tpu.vector_store %arg7[%c0_33, %c896], %31 {strides = array<i32>} : memref<16x1024xbf16, #tpu.memory_space<vmem>>, vector<16x128xbf16>,
    %33 = arith.truncf %28 : vector<16x768xf32> to vector<16x768xbf16>
    %c0_34 = arith.constant 0 : index
    %c128_35 = arith.constant 128 : index
    %34 = vector.load %arg7[%c0_34, %c128_35] : memref<16x1024xbf16, #tpu.memory_space<vmem>>, vector<16x768xbf16>
    tpu.vector_store %arg7[%c0_34, %c128_35], %33 {strides = array<i32>} : memref<16x1024xbf16, #tpu.memory_space<vmem>>, vector<16x768xbf16>,
    %c0_36 = arith.constant 0 : index
    %c109_37 = arith.constant 109 : index
    %35 = vector.load %arg7[%c0_36, %c109_37] : memref<16x1024xbf16, #tpu.memory_space<vmem>>, vector<16x768xbf16>
    %c0_38 = arith.constant 0 : index
    %c0_39 = arith.constant 0 : index
    %36 = vector.load %arg9[%c0_38, %c0_39] : memref<144x768xbf16, #tpu.memory_space<vmem>>, vector<16x768xbf16>
    tpu.vector_store %arg9[%c0_38, %c0_39], %35 {strides = array<i32>} : memref<144x768xbf16, #tpu.memory_space<vmem>>, vector<16x768xbf16>,
    %c0_40 = arith.constant 0 : index
    %c110_41 = arith.constant 110 : index
    %37 = vector.load %arg7[%c0_40, %c110_41] : memref<16x1024xbf16, #tpu.memory_space<vmem>>, vector<16x768xbf16>
    %c16_42 = arith.constant 16 : index
    %c0_43 = arith.constant 0 : index
    %38 = vector.load %arg9[%c16_42, %c0_43] : memref<144x768xbf16, #tpu.memory_space<vmem>>, vector<16x768xbf16>
    tpu.vector_store %arg9[%c16_42, %c0_43], %37 {strides = array<i32>} : memref<144x768xbf16, #tpu.memory_space<vmem>>, vector<16x768xbf16>,
    %c0_44 = arith.constant 0 : index
    %c111_45 = arith.constant 111 : index
    %39 = vector.load %arg7[%c0_44, %c111_45] : memref<16x1024xbf16, #tpu.memory_space<vmem>>, vector<16x768xbf16>
    %c32_46 = arith.constant 32 : index
    %c0_47 = arith.constant 0 : index
    %40 = vector.load %arg9[%c32_46, %c0_47] : memref<144x768xbf16, #tpu.memory_space<vmem>>, vector<16x768xbf16>
    tpu.vector_store %arg9[%c32_46, %c0_47], %39 {strides = array<i32>} : memref<144x768xbf16, #tpu.memory_space<vmem>>, vector<16x768xbf16>,
    %c0_48 = arith.constant 0 : index
    %c127_49 = arith.constant 127 : index
    %41 = vector.load %arg7[%c0_48, %c127_49] : memref<16x1024xbf16, #tpu.memory_space<vmem>>, vector<16x768xbf16>
    %c48 = arith.constant 48 : index
    %c0_50 = arith.constant 0 : index
    %42 = vector.load %arg9[%c48, %c0_50] : memref<144x768xbf16, #tpu.memory_space<vmem>>, vector<16x768xbf16>
    tpu.vector_store %arg9[%c48, %c0_50], %41 {strides = array<i32>} : memref<144x768xbf16, #tpu.memory_space<vmem>>, vector<16x768xbf16>,
    %c0_51 = arith.constant 0 : index
    %c128_52 = arith.constant 128 : index
    %43 = vector.load %arg7[%c0_51, %c128_52] : memref<16x1024xbf16, #tpu.memory_space<vmem>>, vector<16x768xbf16>
    %c64 = arith.constant 64 : index
    %c0_53 = arith.constant 0 : index
    %44 = vector.load %arg9[%c64, %c0_53] : memref<144x768xbf16, #tpu.memory_space<vmem>>, vector<16x768xbf16>
    tpu.vector_store %arg9[%c64, %c0_53], %43 {strides = array<i32>} : memref<144x768xbf16, #tpu.memory_space<vmem>>, vector<16x768xbf16>,
    %c0_54 = arith.constant 0 : index
    %c129_55 = arith.constant 129 : index
    %45 = vector.load %arg7[%c0_54, %c129_55] : memref<16x1024xbf16, #tpu.memory_space<vmem>>, vector<16x768xbf16>
    %c80 = arith.constant 80 : index
    %c0_56 = arith.constant 0 : index
    %46 = vector.load %arg9[%c80, %c0_56] : memref<144x768xbf16, #tpu.memory_space<vmem>>, vector<16x768xbf16>
    tpu.vector_store %arg9[%c80, %c0_56], %45 {strides = array<i32>} : memref<144x768xbf16, #tpu.memory_space<vmem>>, vector<16x768xbf16>,
    %c0_57 = arith.constant 0 : index
    %c145_58 = arith.constant 145 : index
    %47 = vector.load %arg7[%c0_57, %c145_58] : memref<16x1024xbf16, #tpu.memory_space<vmem>>, vector<16x768xbf16>
    %c96 = arith.constant 96 : index
    %c0_59 = arith.constant 0 : index
    %48 = vector.load %arg9[%c96, %c0_59] : memref<144x768xbf16, #tpu.memory_space<vmem>>, vector<16x768xbf16>
    tpu.vector_store %arg9[%c96, %c0_59], %47 {strides = array<i32>} : memref<144x768xbf16, #tpu.memory_space<vmem>>, vector<16x768xbf16>,
    %c0_60 = arith.constant 0 : index
    %c146_61 = arith.constant 146 : index
    %49 = vector.load %arg7[%c0_60, %c146_61] : memref<16x1024xbf16, #tpu.memory_space<vmem>>, vector<16x768xbf16>
    %c112 = arith.constant 112 : index
    %c0_62 = arith.constant 0 : index
    %50 = vector.load %arg9[%c112, %c0_62] : memref<144x768xbf16, #tpu.memory_space<vmem>>, vector<16x768xbf16>
    tpu.vector_store %arg9[%c112, %c0_62], %49 {strides = array<i32>} : memref<144x768xbf16, #tpu.memory_space<vmem>>, vector<16x768xbf16>,
    %c0_63 = arith.constant 0 : index
    %c147_64 = arith.constant 147 : index
    %51 = vector.load %arg7[%c0_63, %c147_64] : memref<16x1024xbf16, #tpu.memory_space<vmem>>, vector<16x768xbf16>
    %c128_65 = arith.constant 128 : index
    %c0_66 = arith.constant 0 : index
    %52 = vector.load %arg9[%c128_65, %c0_66] : memref<144x768xbf16, #tpu.memory_space<vmem>>, vector<16x768xbf16>
    tpu.vector_store %arg9[%c128_65, %c0_66], %51 {strides = array<i32>} : memref<144x768xbf16, #tpu.memory_space<vmem>>, vector<16x768xbf16>,
    %c0_67 = arith.constant 0 : index
    %c0_68 = arith.constant 0 : index
    %53 = vector.load %arg3[%c0_67, %c0_68] : memref<4x144xbf16, #tpu.memory_space<vmem>>, vector<4x144xbf16>
    %c0_69 = arith.constant 0 : index
    %c0_70 = arith.constant 0 : index
    %54 = vector.load %arg9[%c0_69, %c0_70] : memref<144x768xbf16, #tpu.memory_space<vmem>>, vector<144x768xbf16>
    %cst_71 = arith.constant dense<0.000000e+00> : vector<4x768xf32>
    %55 = tpu.matmul %53, %54, %cst_71 {dimension_numbers = #tpu.dot_dimension_numbers<[1], [0], [0], [1], [0, 0, 1, 1], [], []>} : vector<4x144xbf16>, vector<144x768xbf16>, vector<4x768xf32> -> vector<4x768xf32>
    %c0_72 = arith.constant 0 : index
    %c0_73 = arith.constant 0 : index
    %56 = vector.load %arg4[%c0_72, %c0_73] : memref<1x768xf32, #tpu.memory_space<vmem>>, vector<1x768xf32>
    %57 = vector.broadcast %56 : vector<1x768xf32> to vector<4x768xf32>
    %58 = arith.mulf %55, %57 : vector<4x768xf32>
    %cst_74 = arith.constant 0.000000e+00 : f32
    %59 = vector.broadcast %cst_74 : f32 to vector<4x128xf32>
    %c0_75 = arith.constant 0 : index
    %c0_76 = arith.constant 0 : index
    %60 = vector.load %arg5[%c0_75, %c0_76] : memref<4x1024xf32, #tpu.memory_space<vmem>>, vector<4x128xf32>
    tpu.vector_store %arg5[%c0_75, %c0_76], %59 {strides = array<i32>} : memref<4x1024xf32, #tpu.memory_space<vmem>>, vector<4x128xf32>,
    %cst_77 = arith.constant 0.000000e+00 : f32
    %61 = vector.broadcast %cst_77 : f32 to vector<4x128xf32>
    %c0_78 = arith.constant 0 : index
    %c896_79 = arith.constant 896 : index
    %62 = vector.load %arg5[%c0_78, %c896_79] : memref<4x1024xf32, #tpu.memory_space<vmem>>, vector<4x128xf32>
    tpu.vector_store %arg5[%c0_78, %c896_79], %61 {strides = array<i32>} : memref<4x1024xf32, #tpu.memory_space<vmem>>, vector<4x128xf32>,
    %c0_80 = arith.constant 0 : index
    %c128_81 = arith.constant 128 : index
    %63 = vector.load %arg5[%c0_80, %c128_81] : memref<4x1024xf32, #tpu.memory_space<vmem>>, vector<4x768xf32>
    tpu.vector_store %arg5[%c0_80, %c128_81], %58 {strides = array<i32>} : memref<4x1024xf32, #tpu.memory_space<vmem>>, vector<4x768xf32>,
    return
  }
  func.func @transform_0(%arg0: i32) -> (i32, i32) {
    %c0_i32 = arith.constant 0 : i32
    %c0_i32_0 = arith.constant 0 : i32
    %c0_i32_1 = arith.constant 0 : i32
    return %c0_i32, %c0_i32_0 : i32, i32
  }
  func.func @transform_1(%arg0: i32) -> (i32, i32) {
    %c0_i32 = arith.constant 0 : i32
    %c0_i32_0 = arith.constant 0 : i32
    %c0_i32_1 = arith.constant 0 : i32
    return %c0_i32, %c0_i32_0 : i32, i32
  }
  func.func @transform_2(%arg0: i32) -> (i32, i32) {
    %c0_i32 = arith.constant 0 : i32
    %c0_i32_0 = arith.constant 0 : i32
    %c0_i32_1 = arith.constant 0 : i32
    return %c0_i32, %c0_i32_0 : i32, i32
  }
  func.func @transform_3(%arg0: i32) -> (i32, i32) {
    %c0_i32 = arith.constant 0 : i32
    %c0_i32_0 = arith.constant 0 : i32
    %c0_i32_1 = arith.constant 0 : i32
    return %c0_i32, %c0_i32_0 : i32, i32
  }
  func.func @transform_4(%arg0: i32) -> (i32, i32) {
    %c0_i32 = arith.constant 0 : i32
    %c0_i32_0 = arith.constant 0 : i32
    %c0_i32_1 = arith.constant 0 : i32
    return %c0_i32, %c0_i32_0 : i32, i32
  }
}

</mosaic_0001>

<bundles_post_ra>
// kernel: tile.8
= control target key start
LH: loop header
LB: loop body
LE: loop exit
PB: predicated region body
PF: predicated region fallthrough
CT: control target
= control target key end

     0   :  { %s46_s0 = inlined_call_operand.vmem [shape: f32[324], index: 0, kind: input, shape index: {}]   ;;  %s47_s1 = inlined_call_operand.vmem [shape: f32[2,324], index: 1, kind: output, shape index: {}]  }
   0x1   :  { %v4_v0 = vld [vmem:[%s46_s0] ss:$0 sm:$0xff]  ;;  %v14_v1 = vld [vmem:[%s46_s0 + $0x1] ss:$0 sm:$0xff]  ;;  %v16_v2 = vld [vmem:[%s46_s0 + $0x2] ss:$0 sm:$0xff] }
   0x2   :  { %5 = vst [vmem:[%s47_s1] sm:$0x3] %v4_v0  ;;  %15 = vst [vmem:[%s47_s1 + $0x2] sm:$0x3] %v14_v1 }
   0x3   :  { %17 = vst [vmem:[%s47_s1 + $0x4] sm:$0x3] %v16_v2 }

// kernel: tile.9
= control target key start
LH: loop header
LB: loop body
LE: loop exit
PB: predicated region body
PF: predicated region fallthrough
CT: control target
= control target key end

     0   :  { %vm27_vm0 = vcmask 490496   ;;  %vm17_vm1 = vcmask 556032   ;;  %s38_s12 = smov 3  ;;  %s53_s13 = smov 68   ;;  %vm31_vm2 = vcmask 64512   ;;  %vm34_vm3 = vcmask 1048096   ;;  %s90_s0 = inlined_call_operand.vmem [shape: f32[2,324], index: 0, kind: input, shape index: {}]   ;;  %s91_s1 = inlined_call_operand.vmem [shape: f32[648], index: 1, kind: output, shape index: {}]  }
   0x1   :  { %v46_v0 = vld [vmem:[%s90_s0 + $0x4] sm:$0x3]  ;;  %v47_v1 = vld [vmem:[%s90_s0 + $0x2] sm:$0x3]  ;;  %v13_v2 = vld [vmem:[%s90_s0] sm:$0x3] }
   0x2   :  { %8 = vst [vmem:[#allocation0 + $0x10] sm:$0x3] %v46_v0  ;;  %12 = vst [vmem:[#allocation0 + $0x8] sm:$0x3] %v47_v1  ;;  %s20_s0 = smov 3 }
   0x3   :  { %14 = vst [vmem:[#allocation0] sm:$0x3] %v13_v2 }
   0x9   :  { %v24_v3 = vld [vmem:[#allocation0 + $0x11] sm:$0x1]   ;;  %v16_v7 = vld [vmem:[#allocation0 + $0x10] sm:$0x1]  }
   0xa   :  { %v26_v4 = vld [vmem:[#allocation0 + $0x1] ss:$8 sm:$0x7]   ;;  %v21_v6 = vld [vmem:[#allocation0] ss:$8 sm:%s20_s0]  }
   0xb   :  { %v28_v5 = vsel %vm27_vm0, %v26_v4, %v24_v3  ;;  %22 = vst [vmem:[%s91_s1] sm:$0x3] %v21_v6   ;;  %48 = vst.msk [vmem:[%s91_s1 + $0x2] sm:$0x1] %vm17_vm1, %v16_v7   ;;  %v39_v8 = vld [vmem:[#allocation0 + $0x1] ss:$8 sm:%s38_s12]  }
   0xc   :  { %29 = vrot.lane.b32.xlu0 %v28_v5, %s53_s13 }
  0x10   :  { %40 = vrot.lane.b32.xlu0 %v39_v8, %s53_s13 }
  0x7e   :  { %v30_v9 = vpop.permute.xlu0 %29  }
  0x7f   :  { %49 = vst.msk [vmem:[%s91_s1 + $0x5] sm:$0x1] %vm31_vm2, %v30_v9  }
  0x80   :  { %50 = vst.msk [vmem:[%s91_s1 + $0x2] sm:$0x7] %vm34_vm3, %v30_v9  }
  0x82   :  { %v41_v10 = vpop.permute.xlu0 %40  }
  0x83   :  { %51 = vst.msk [vmem:[%s91_s1 + $0x3] sm:$0x3] %vm17_vm1, %v41_v10  }

// kernel: _forward_flat_jit.1
= control target key start
LH: loop header
LB: loop body
LE: loop exit
PB: predicated region body
PF: predicated region fallthrough
CT: control target
= control target key end

     0   :  { %v56_v2 = vlaneseq  ;;  %v1667_v5 = vmov 1983009808   ;;  %s2189_s0 = inlined_call_operand.vmem [shape: f32[4,1024], index: 0, kind: input, shape index: {}]   ;;  %s2190_s1 = inlined_call_operand.vmem [shape: bf16[16,36], index: 1, kind: input, shape index: {}]   ;;  %s2191_s2 = inlined_call_operand.vmem [shape: bf16[4,144], index: 2, kind: input, shape index: {}]   ;;  %s2192_s3 = inlined_call_operand.vmem [shape: f32[1,768], index: 3, kind: input, shape index: {}]   ;;  %s2193_s4 = inlined_call_operand.hbm [shape: f32[4,1024], index: 4, kind: output, shape index: {}]  }
   0x1   :  { %v19_v0 = vld [vmem:[%s2189_s0] sm:$0xff]  ;;  %v20_v1 = vld [vmem:[%s2189_s0 + $0x8] sm:$0xff]  ;;  %v54_v6 = vunpack.c.l.s4 %v1667_v5  ;;  %v21_v7 = vld [vmem:[%s2189_s0 + $0x10] sm:$0xff] }
   0x2   :  { %v27_v3 = vcombine.high %v19_v0, %v19_v0  ;;  %v28_v4 = vcombine.high %v20_v1, %v20_v1  ;;  %v22_v8 = vld [vmem:[%s2189_s0 + $0x18] sm:$0xff]  ;;  %v1716_v9 = vshrl.u32 %v56_v2, 7  ;;  %v29_v10 = vcombine.high %v21_v7, %v21_v7 }
   0x3   :  { %v30_v11 = vcombine.high %v22_v8, %v22_v8  ;;  %v55_v14 = vunpack.c.0.s8 %v54_v6 }
   0x4   :  { %v1554_v12 = vpack.c.bf16 %v27_v3, %v19_v0  ;;  %v1555_v13 = vpack.c.bf16 %v28_v4, %v20_v1 }
   0x5   :  { %9 = vsyncpa [#allocation7], 0  ;;  %v1556_v15 = vpack.c.bf16 %v29_v10, %v21_v7  ;;  %v1557_v16 = vpack.c.bf16 %v30_v11, %v22_v8  ;;  %v1719_v17 = vsub.s32 %v55_v14, %v1716_v9  ;;  %s1668_s0 = smov 18   ;;  %s1669_s23 = smov 19   ;;  %v1676_v49 = vmov 0  }
   0x6   :  { %s1670_s24 = smov 1   ;;  %s1671_s25 = smov 17   ;;  %746 = vmatprep.mubr.bf16.mxu0 %v1676_v49  ;;  %vm135_vm0 = vcmask 1043456   ;;  %vm196_vm1 = vcmask 146432   ;;  %vm137_vm2 = vcmask 154624   ;;  %vm255_vm3 = vcmask 138240  }
   0x7   :  { %v59_v18 = vrot.slane %v1554_v12, %v1719_v17  ;;  %v66_v19 = vrot.slane %v1555_v13, %v1719_v17  ;;  %v76_v20 = vrot.slane %v1556_v15, %v1719_v17  ;;  %v83_v21 = vrot.slane %v1557_v16, %v1719_v17  ;;  %s1672_s26 = smov 127   ;;  %s1673_s27 = smov 111  }
   0x8   :  { %s1674_s28 = smov 110   ;;  %s1675_s29 = smov 109   ;;  %vm314_vm4 = vcmask 7168   ;;  %vm464_vm5 = vcmask 908288   ;;  %vm405_vm6 = vcmask 1039360   ;;  %vm523_vm7 = vcmask 900096  }
   0x9   :  { %v67_v22 = vcombine.low %v59_v18, %v66_v19  ;;  %v84_v23 = vcombine.low %v76_v20, %v83_v21  ;;  %v1641_v25 = vcombine.low %v59_v18, %v59_v18  ;;  %v1642_v26 = vcombine.low %v66_v19, %v66_v19 }
   0xa   :  { %vm582_vm8 = vcmask 891904   ;;  %vm695_vm9 = vcmask 1041408   ;;  %vm691_vm10 = vcmask 293888   ;;  %vm1358_vm11 = vcmask 130048  }
   0xb   :  { %87 = vst [vmem:[#allocation2] sm:$0xff] %v67_v22  ;;  %v167_v24 = vrot.slane %v67_v22, %v1719_v17  ;;  %88 = vst [vmem:[#allocation2 + $0x8] sm:$0xff] %v84_v23  ;;  %v160_v30 = vrot.slane %v1641_v25, %v1719_v17  ;;  %v107_v31 = vrot.slane %v1642_v26, %v1719_v17 }
   0xd   :  { %185 = vrot.lane.b32.xlu1 %v167_v24, %s1668_s0  ;;  %123 = vrot.lane.b32.xlu0 %v167_v24, %s1669_s23 }
  0x11   :  { %303 = vrot.lane.b32.xlu1 %v167_v24, %s1670_s24  ;;  %242 = vrot.lane.b32.xlu0 %v167_v24, %s1671_s25 }
  0x12   :  { %v358_v27 = vld [vmem:[#allocation2 + $0x2] sm:$0xff]  ;;  %v359_v43 = vld [vmem:[#allocation2 + $0xa] sm:$0x3f] }
  0x13   :  { %v376_v28 = vrot.slane %v358_v27, %v1719_v17  ;;  %v421_v29 = vcombine.high %v358_v27, %v358_v27  ;;  %1559 = vst.sshfl [vmem:[#allocation4 + $0x30] sm:$0xf pattern:$0x76325410] %v358_v27  ;;  %v362_v32 = vcombine.low %v358_v27, %v358_v27  ;;  %v150_v35 = vld [vmem:[#allocation2 + $0x8] sm:$0x3f]  ;;  %v377_v46 = vcombine.low %v359_v43, %v359_v43 }
  0x14   :  { %v168_v36 = vcombine.low %v150_v35, %v150_v35  ;;  %v90_v37 = vld [vmem:[#allocation2 + $0x8] sm:$0x3f]  ;;  %v182_v57 = vrot.slane %v150_v35, %v1719_v17  ;;  %v391_v1 = vrot.slane %v359_v43, %v1719_v17 }
  0x15   :  { %394 = vrot.lane.b32.xlu1 %v376_v28, %s1672_s26  ;;  %451 = vrot.lane.b32.xlu0 %v376_v28, %s1673_s27  ;;  %1560 = vst.sshfl [vmem:[#allocation4 + $0x38] sm:$0xf pattern:$0x76325410] %v421_v29  ;;  %v435_v33 = vrot.slane %v421_v29, %v1719_v17  ;;  %v369_v34 = vrot.slane %v362_v32, %v1719_v17  ;;  %v268_v38 = vld [vmem:[#allocation2 + $0x8] sm:$0x3f] }
  0x16   :  { %v175_v39 = vrot.slane %v168_v36, %v1719_v17  ;;  %v115_v40 = vrot.slane %v90_v37, %v1719_v17  ;;  %v286_v41 = vcombine.low %v268_v38, %v268_v38  ;;  %v209_v42 = vld [vmem:[#allocation2 + $0x8] sm:$0x3f]  ;;  %v384_v51 = vrot.slane %v377_v46, %v1719_v17 }
  0x17   :  { %v234_v45 = vrot.slane %v209_v42, %v1719_v17  ;;  %v418_v47 = vld [vmem:[#allocation2 + $0xa] sm:$0x3f]  ;;  %v108_v56 = vcombine.high %v90_v37, %v90_v37  ;;  %v227_v59 = vcombine.high %v209_v42, %v209_v42  ;;  %v300_v61 = vrot.slane %v268_v38, %v1719_v17 }
  0x18   :  { %v293_v44 = vrot.slane %v286_v41, %v1719_v17  ;;  %v477_v48 = vld [vmem:[#allocation2 + $0xa] sm:$0x3f]  ;;  %v443_v50 = vrot.slane %v418_v47, %v1719_v17  ;;  %v436_v63 = vcombine.high %v418_v47, %v418_v47 }
  0x19   :  { %183 = vrot.lane.b32.xlu1 %v160_v30, %s1668_s0  ;;  %125 = vrot.lane.b32.xlu0 %v107_v31, %s1669_s23  ;;  %v495_v52 = vcombine.low %v477_v48, %v477_v48  ;;  %v536_v53 = vld [vmem:[#allocation2 + $0xa] sm:$0x3f]  ;;  %v122_v58 = vrot.slane %v108_v56, %v1719_v17  ;;  %v241_v62 = vrot.slane %v227_v59, %v1719_v17 }
  0x1a   :  { %v561_v54 = vrot.slane %v536_v53, %v1719_v17  ;;  %v1558_v60 = vld.sshfl [vmem:[#allocation2 + $0xa] sm:$0x33 pattern:$0x76325410]  ;;  %v450_v0 = vrot.slane %v436_v63, %v1719_v17  ;;  %v554_v2 = vcombine.high %v536_v53, %v536_v53  ;;  %v509_v4 = vrot.slane %v477_v48, %v1719_v17 }
  0x1b   :  { %v502_v55 = vrot.slane %v495_v52, %v1719_v17  ;;  %357 = vst [vmem:[#allocation4 + $0x40] sm:$0x33] %v1558_v60 }
  0x1c   :  { %v568_v3 = vrot.slane %v554_v2, %v1719_v17 }
  0x1d   :  { %244 = vrot.lane.b32.xlu1 %v107_v31, %s1671_s25  ;;  %301 = vrot.lane.b32.xlu0 %v160_v30, %s1670_s24 }
  0x21   :  { %453 = vrot.lane.b32.xlu1 %v435_v33, %s1673_s27  ;;  %392 = vrot.lane.b32.xlu0 %v369_v34, %s1672_s26 }
  0x25   :  { %512 = vrot.lane.b32.xlu1 %v376_v28, %s1674_s28  ;;  %510 = vrot.lane.b32.xlu0 %v369_v34, %s1674_s28 }
  0x29   :  { %571 = vrot.lane.b32.xlu1 %v435_v33, %s1675_s29  ;;  %569 = vrot.lane.b32.xlu0 %v376_v28, %s1675_s29 }
  0x2d   :  { %187 = vrot.lane.b32.xlu1 %v175_v39, %s1668_s0  ;;  %127 = vrot.lane.b32.xlu0 %v115_v40, %s1669_s23 }
  0x31   :  { %305 = vrot.lane.b32.xlu1 %v293_v44, %s1670_s24  ;;  %246 = vrot.lane.b32.xlu0 %v234_v45, %s1671_s25 }
  0x35   :  { %455 = vrot.lane.b32.xlu1 %v443_v50, %s1673_s27  ;;  %396 = vrot.lane.b32.xlu0 %v384_v51, %s1672_s26 }
  0x39   :  { %573 = vrot.lane.b32.xlu1 %v561_v54, %s1675_s29  ;;  %514 = vrot.lane.b32.xlu0 %v502_v55, %s1674_s28 }
  0x3d   :  { %189 = vrot.lane.b32.xlu1 %v182_v57, %s1668_s0  ;;  %129 = vrot.lane.b32.xlu0 %v122_v58, %s1669_s23 }
  0x41   :  { %307 = vrot.lane.b32.xlu1 %v300_v61, %s1670_s24  ;;  %248 = vrot.lane.b32.xlu0 %v241_v62, %s1671_s25 }
  0x45   :  { %457 = vrot.lane.b32.xlu1 %v450_v0, %s1673_s27  ;;  %398 = vrot.lane.b32.xlu0 %v391_v1, %s1672_s26 }
  0x49   :  { %575 = vrot.lane.b32.xlu1 %v568_v3, %s1675_s29  ;;  %516 = vrot.lane.b32.xlu0 %v509_v4, %s1674_s28 }
  0x4d   :  { %973 = vrot.lane.b32.xlu1 %v1676_v49, %s1668_s0  ;;  %927 = vrot.lane.b32.xlu0 %v1676_v49, %s1669_s23 }
  0x51   :  { %1065 = vrot.lane.b32.xlu1 %v1676_v49, %s1670_s24  ;;  %1019 = vrot.lane.b32.xlu0 %v1676_v49, %s1671_s25 }
  0x55   :  { %1135 = vrot.lane.b32.xlu1 %v1676_v49, %s1672_s26 }
  0x7f   :  { %v1790_v5 = vpop.permute.xlu1 %185  ;;  %v124_v6 = vpop.permute.xlu0 %123 }
  0x80   :  { %v192_v14 = vrot.slane %v1790_v5, 4  ;;  %v131_v15 = vrot.slane %v124_v6, 4 }
  0x83   :  { %v1792_v7 = vpop.permute.xlu1 %303  ;;  %v243_v8 = vpop.permute.xlu0 %242 }
  0x84   :  { %v310_v24 = vrot.slane %v1792_v7, 4  ;;  %v250_v25 = vrot.slane %v243_v8, 4 }
  0x87   :  { %v1794_v10 = vpop.permute.xlu1 %394  ;;  %v452_v11 = vpop.permute.xlu0 %451 }
  0x88   :  { %v401_v34 = vrot.slane %v1794_v10, 4  ;;  %v459_v35 = vrot.slane %v452_v11, 4 }
  0x8b   :  { %v184_v12 = vpop.permute.xlu1 %183  ;;  %v1796_v13 = vpop.permute.xlu0 %125 }
  0x8c   :  { %v191_v16 = vrot.slane %v184_v12, 4  ;;  %v132_v17 = vrot.slane %v1796_v13, 4 }
  0x8e   :  { %v195_v18 = vsel %vm135_vm0, %v191_v16, %v192_v14  ;;  %v136_v19 = vsel %vm135_vm0, %v131_v15, %v132_v17 }
  0x8f   :  { %v197_v20 = vsel %vm196_vm1, %v184_v12, %v195_v18  ;;  %v138_v21 = vsel %vm137_vm2, %v124_v6, %v136_v19  ;;  %v1806_v22 = vpop.permute.xlu1 %244  ;;  %v302_v23 = vpop.permute.xlu0 %301 }
  0x90   :  { %205 = vst [vmem:[#allocation4] sm:$0xcc] %v197_v20  ;;  %146 = vst [vmem:[#allocation4] sm:$0x33] %v138_v21  ;;  %v251_v26 = vrot.slane %v1806_v22, 4  ;;  %v309_v27 = vrot.slane %v302_v23, 4 }
  0x92   :  { %v254_v28 = vsel %vm135_vm0, %v250_v25, %v251_v26  ;;  %v313_v29 = vsel %vm135_vm0, %v309_v27, %v310_v24 }
  0x93   :  { %v256_v30 = vsel %vm255_vm3, %v243_v8, %v254_v28  ;;  %v315_v31 = vsel %vm314_vm4, %v302_v23, %v313_v29  ;;  %v1816_v32 = vpop.permute.xlu1 %453  ;;  %v393_v33 = vpop.permute.xlu0 %392  ;;  %v1881_v23 = vld [vmem:[%s2190_s1] sm:$0xff]  }
  0x94   :  { %264 = vst [vmem:[#allocation4 + $0x18] sm:$0x33] %v256_v30  ;;  %323 = vst [vmem:[#allocation4 + $0x18] sm:$0xcc] %v315_v31  ;;  %v460_v36 = vrot.slane %v1816_v32, 4  ;;  %v400_v37 = vrot.slane %v393_v33, 4 }
  0x96   :  { %v463_v38 = vsel %vm135_vm0, %v459_v35, %v460_v36  ;;  %v404_v39 = vsel %vm135_vm0, %v400_v37, %v401_v34 }
  0x97   :  { %v465_v40 = vsel %vm464_vm5, %v452_v11, %v463_v38  ;;  %v406_v41 = vsel %vm405_vm6, %v393_v33, %v404_v39  ;;  %v1826_v42 = vpop.permute.xlu1 %512  ;;  %v511_v43 = vpop.permute.xlu0 %510 }
  0x98   :  { %473 = vst [vmem:[#allocation4 + $0x48] sm:$0x33] %v465_v40  ;;  %414 = vst [vmem:[#allocation4 + $0x30] sm:$0xcc] %v406_v41  ;;  %v519_v44 = vrot.slane %v1826_v42, 4  ;;  %v518_v45 = vrot.slane %v511_v43, 4 }
  0x9a   :  { %v522_v46 = vsel %vm135_vm0, %v518_v45, %v519_v44 }
  0x9b   :  { %v524_v47 = vsel %vm523_vm7, %v511_v43, %v522_v46  ;;  %v1833_v48 = vpop.permute.xlu1 %571  ;;  %v570_v50 = vpop.permute.xlu0 %569  ;;  %v1616_v51 = vld [vmem:[#allocation4 + $0x4] ss:$24 sps:$4 sm:$0xff]   ;;  %v1618_v52 = vld [vmem:[#allocation4] ss:$24 sps:$4 sm:$0xff]  }
  0x9c   :  { %532 = vst [vmem:[#allocation4 + $0x48] sm:$0xcc] %v524_v47  ;;  %v578_v53 = vrot.slane %v1833_v48, 4  ;;  %v577_v54 = vrot.slane %v570_v50, 4  ;;  %714 = vmatprep.subr.bf16.mxu0 %v1616_v51 }
  0x9d   :  { %715 = vmatpush1.bf16.msra.mxu0 %v1618_v52 }
  0x9e   :  { %v581_v55 = vsel %vm135_vm0, %v577_v54, %v578_v53 }
  0x9f   :  { %v583_v56 = vsel %vm582_vm8, %v570_v50, %v581_v55  ;;  %v1838_v57 = vpop.permute.xlu1 %187  ;;  %v1840_v58 = vpop.permute.xlu0 %127 }
  0xa0   :  { %591 = vst [vmem:[#allocation4 + $0x60] sm:$0x33] %v583_v56  ;;  %v193_v59 = vrot.slane %v1838_v57, 4  ;;  %v133_v60 = vrot.slane %v1840_v58, 4 }
  0xa2   :  { %v198_v61 = vsel %vm135_vm0, %v192_v14, %v193_v59  ;;  %v139_v62 = vsel %vm135_vm0, %v132_v17, %v133_v60 }
  0xa3   :  { %v199_v63 = vsel %vm196_vm1, %v1790_v5, %v198_v61  ;;  %v140_v0 = vsel %vm137_vm2, %v1796_v13, %v139_v62  ;;  %v1852_v1 = vpop.permute.xlu1 %305  ;;  %v1854_v2 = vpop.permute.xlu0 %246  ;;  %v1619_v3 = vld [vmem:[#allocation4 + $0x34] ss:$24 sps:$4 sm:$0xff]   ;;  %v1621_v4 = vld [vmem:[#allocation4 + $0x30] ss:$24 sps:$4 sm:$0xff]  }
  0xa4   :  { %206 = vst [vmem:[#allocation4 + $0x8] sm:$0xcc] %v199_v63  ;;  %147 = vst [vmem:[#allocation4 + $0x8] sm:$0x33] %v140_v0  ;;  %v311_v6 = vrot.slane %v1852_v1, 4  ;;  %v252_v8 = vrot.slane %v1854_v2, 4  ;;  %716 = vmatprep.subr.bf16.mxu0 %v1619_v3 }
  0xa5   :  { %717 = vmatpush1.bf16.msra.mxu0 %v1621_v4 }
  0xa6   :  { %v316_v5 = vsel %vm135_vm0, %v310_v24, %v311_v6  ;;  %v257_v11 = vsel %vm135_vm0, %v251_v26, %v252_v8 }
  0xa7   :  { %v317_v12 = vsel %vm314_vm4, %v1792_v7, %v316_v5  ;;  %v258_v13 = vsel %vm255_vm3, %v1806_v22, %v257_v11  ;;  %v1866_v14 = vpop.permute.xlu1 %455  ;;  %v1868_v15 = vpop.permute.xlu0 %396  ;;  %v608_v16 = vld [vmem:[#allocation4 + $0x60] sm:$0x33] }
  0xa8   :  { %324 = vst [vmem:[#allocation4 + $0x20] sm:$0xcc] %v317_v12  ;;  %265 = vst [vmem:[#allocation4 + $0x20] sm:$0x33] %v258_v13  ;;  %v461_v17 = vrot.slane %v1866_v14, 4  ;;  %v402_v18 = vrot.slane %v1868_v15, 4  ;;  %v1575_v19 = vcombine.high %v608_v16, %v608_v16  ;;  %v1574_v20 = vcombine.low %v608_v16, %v608_v16 }
  0xaa   :  { %v466_v21 = vsel %vm135_vm0, %v460_v36, %v461_v17  ;;  %v407_v7 = vsel %vm135_vm0, %v401_v34, %v402_v18  ;;  %1580 = vmatprep.subr.msk.bf16.mxu0 %vm695_vm9, %v1575_v19  ;;  %v697_v22 = vsel %vm695_vm9, %v1574_v20, 0 }
  0xab   :  { %v467_v24 = vsel %vm464_vm5, %v1816_v32, %v466_v21  ;;  %v408_v25 = vsel %vm405_vm6, %v1794_v10, %v407_v7  ;;  %v1887_v26 = vpop.permute.xlu1 %573  ;;  %719 = vmatpush1.bf16.msra.mxu0 %v697_v22  ;;  %v1889_v27 = vpop.permute.xlu0 %514  ;;  %v859_v21 = vsub.s32 0, %v1716_v9  ;;  %v855_v7 = vld [vmem:[%s2192_s3] sm:$0x3f]  ;;  %v863_v22 = vsub.s32 1, %v1716_v9 }
  0xac   :  { %474 = vst [vmem:[#allocation4 + $0x50] sm:$0x33] %v467_v24  ;;  %415 = vst [vmem:[#allocation4 + $0x38] sm:$0xcc] %v408_v25  ;;  %v579_v28 = vrot.slane %v1887_v26, 4  ;;  %v520_v29 = vrot.slane %v1889_v27, 4 }
  0xae   :  { %v584_v30 = vsel %vm135_vm0, %v578_v53, %v579_v28  ;;  %v525_v31 = vsel %vm135_vm0, %v519_v44, %v520_v29  ;;  %1581 = vmatmul.mubr.msk.bf16.vlgmr.msra.gmra.mrb[0].mxu0 %vm691_vm10, %v1881_v23 }
  0xaf   :  { %v585_v10 = vsel %vm582_vm8, %v1833_v48, %v584_v30  ;;  %v526_v32 = vsel %vm523_vm7, %v1826_v42, %v525_v31  ;;  %v190_v33 = vpop.permute.xlu1 %189  ;;  %v130_v34 = vpop.permute.xlu0 %129  ;;  %v1625_v35 = vld [vmem:[#allocation4 + $0x8] ss:$24 sps:$4 sm:$0xff]   ;;  %v1627_v36 = vld [vmem:[#allocation4 + $0xc] ss:$24 sps:$4 sm:$0xff]   ;;  %789 = vmatprep.mubr.bf16.mxu0 %v1676_v49 }
  0xb0   :  { %592 = vst [vmem:[#allocation4 + $0x68] sm:$0x33] %v585_v10  ;;  %533 = vst [vmem:[#allocation4 + $0x50] sm:$0xcc] %v526_v32  ;;  %v194_v37 = vrot.slane %v190_v33, 4  ;;  %v134_v38 = vrot.slane %v130_v34, 4  ;;  %757 = vmatprep.subr.bf16.mxu0 %v1627_v36 }
  0xb1   :  { %758 = vmatpush1.bf16.msra.mxu0 %v1625_v35 }
  0xb2   :  { %v200_v39 = vsel %vm135_vm0, %v193_v59, %v194_v37  ;;  %v141_v40 = vsel %vm135_vm0, %v133_v60, %v134_v38  ;;  %v867_v38 = vsub.s32 2, %v1716_v9 }
  0xb3   :  { %v201_v41 = vsel %vm196_vm1, %v1838_v57, %v200_v39  ;;  %v142_v42 = vsel %vm137_vm2, %v1840_v58, %v141_v40  ;;  %v308_v43 = vpop.permute.xlu1 %307  ;;  %v249_v44 = vpop.permute.xlu0 %248  ;;  %v871_v39 = vsub.s32 3, %v1716_v9 }
  0xb4   :  { %207 = vst [vmem:[#allocation4 + $0x10] sm:$0xcc] %v201_v41  ;;  %148 = vst [vmem:[#allocation4 + $0x10] sm:$0x33] %v142_v42  ;;  %v312_v45 = vrot.slane %v308_v43, 4  ;;  %v253_v46 = vrot.slane %v249_v44, 4  ;;  %v868_v40 = vrot.slane %v855_v7, %v867_v38 }
  0xb5   :  { %v872_v42 = vrot.slane %v855_v7, %v871_v39 }
  0xb6   :  { %v318_v47 = vsel %vm135_vm0, %v311_v6, %v312_v45  ;;  %v259_v48 = vsel %vm135_vm0, %v252_v8, %v253_v46 }
  0xb7   :  { %v319_v50 = vsel %vm314_vm4, %v1852_v1, %v318_v47  ;;  %v260_v51 = vsel %vm255_vm3, %v1854_v2, %v259_v48  ;;  %v458_v52 = vpop.permute.xlu1 %457  ;;  %v399_v53 = vpop.permute.xlu0 %398  ;;  %v1628_v54 = vld [vmem:[#allocation4 + $0x38] ss:$24 sps:$4 sm:$0xff]   ;;  %v1630_v55 = vld [vmem:[#allocation4 + $0x3c] ss:$24 sps:$4 sm:$0xff]   ;;  %v609_v58 = vld [vmem:[#allocation4 + $0x68] sm:$0x33] }
  0xb8   :  { %325 = vst [vmem:[#allocation4 + $0x28] sm:$0xcc] %v319_v50  ;;  %266 = vst [vmem:[#allocation4 + $0x28] sm:$0x33] %v260_v51  ;;  %v462_v56 = vrot.slane %v458_v52, 4  ;;  %v403_v57 = vrot.slane %v399_v53, 4  ;;  %759 = vmatprep.subr.bf16.mxu0 %v1630_v55  ;;  %v1577_v59 = vcombine.high %v609_v58, %v609_v58  ;;  %v1576_v60 = vcombine.low %v609_v58, %v609_v58 }
  0xb9   :  { %760 = vmatpush1.bf16.msra.mxu0 %v1628_v54  ;;  %v879_v58 = vsub.s32 5, %v1716_v9 }
  0xba   :  { %v468_v61 = vsel %vm135_vm0, %v461_v17, %v462_v56  ;;  %v409_v62 = vsel %vm135_vm0, %v402_v18, %v403_v57  ;;  %1582 = vmatprep.subr.msk.bf16.mxu0 %vm695_vm9, %v1577_v59  ;;  %v703_v6 = vsel %vm695_vm9, %v1576_v60, 0  ;;  %v875_v57 = vsub.s32 4, %v1716_v9 }
  0xbb   :  { %v469_v63 = vsel %vm464_vm5, %v1866_v14, %v468_v61  ;;  %v410_v0 = vsel %vm405_vm6, %v1868_v15, %v409_v62  ;;  %v576_v1 = vpop.permute.xlu1 %575  ;;  %v517_v2 = vpop.permute.xlu0 %516  ;;  %v880_v61 = vrot.slane %v855_v7, %v879_v58 }
  0xbc   :  { %475 = vst [vmem:[#allocation4 + $0x58] sm:$0x33] %v469_v63  ;;  %416 = vst [vmem:[#allocation4 + $0x40] sm:$0xcc] %v410_v0  ;;  %v580_v3 = vrot.slane %v576_v1, 4  ;;  %v521_v4 = vrot.slane %v517_v2, 4  ;;  %v876_v59 = vrot.slane %v855_v7, %v875_v57 }
  0xbd   :  { %762 = vmatpush1.bf16.msra.mxu0 %v703_v6 }
  0xbe   :  { %v586_v8 = vsel %vm135_vm0, %v579_v28, %v580_v3  ;;  %v527_v5 = vsel %vm135_vm0, %v520_v29, %v521_v4  ;;  %v864_v29 = vrot.slane %v855_v7, %v863_v22 }
  0xbf   :  { %v587_v11 = vsel %vm582_vm8, %v1887_v26, %v586_v8  ;;  %v528_v12 = vsel %vm523_vm7, %v1889_v27, %v527_v5  ;;  %v1633_v13 = vld [vmem:[#allocation4 + $0x10] ss:$24 sps:$4 sm:$0xff]   ;;  %v1635_v14 = vld [vmem:[#allocation4 + $0x14] ss:$24 sps:$4 sm:$0xff]   ;;  %v860_v26 = vrot.slane %v855_v7, %v859_v21 }
  0xc0   :  { %593 = vst [vmem:[#allocation4 + $0x70] sm:$0x33] %v587_v11  ;;  %534 = vst [vmem:[#allocation4 + $0x58] sm:$0xcc] %v528_v12  ;;  %800 = vmatprep.subr.bf16.mxu0 %v1635_v14  ;;  %1583 = vmatmul.mubr.msk.bf16.vlgmr.msra.gmra.mrb[4].mxu0 %vm691_vm10, %v1881_v23 }
  0xc1   :  { %801 = vmatpush1.bf16.msra.mxu0 %v1633_v13  ;;  %832 = vmatprep.mubr.bf16.mxu0 %v1676_v49  ;;  %v2025_v14 = vld.sshfl [vmem:[%s2191_s2] sm:$0x33 pattern:$0x76325410] }
  0xc7   :  { %v1636_v15 = vld [vmem:[#allocation4 + $0x40] ss:$24 sps:$4 sm:$0xff]   ;;  %v1638_v16 = vld [vmem:[#allocation4 + $0x44] ss:$24 sps:$4 sm:$0xff]   ;;  %v610_v17 = vld [vmem:[#allocation4 + $0x70] sm:$0x33] }
  0xc8   :  { %802 = vmatprep.subr.bf16.mxu0 %v1638_v16  ;;  %v1579_v18 = vcombine.high %v610_v17, %v610_v17  ;;  %v1578_v19 = vcombine.low %v610_v17, %v610_v17  ;;  %v974_v16 = vpop.permute.xlu1 %973 }
  0xc9   :  { %803 = vmatpush1.bf16.msra.mxu0 %v1636_v15  ;;  %v2029_v15 = vcombine.high %v2025_v14, %v2025_v14 }
  0xca   :  { %1584 = vmatprep.subr.msk.bf16.mxu0 %vm695_vm9, %v1579_v18  ;;  %v709_v20 = vsel %vm695_vm9, %v1578_v19, 0  ;;  %v928_v18 = vpop.permute.xlu0 %927 }
  0xcb   :  { %1587 = vmatprep.mubr.msk.bf16.mxu1 %vm1358_vm11, %v2029_v15 }
  0xcc   :  { %v1066_v17 = vpop.permute.xlu1 %1065 }
  0xcd   :  { %805 = vmatpush1.bf16.msra.mxu0 %v709_v20 }
  0xce   :  { %v1020_v20 = vpop.permute.xlu0 %1019 }
  0xd0   :  { %1585 = vmatmul.mubr.msk.bf16.vlgmr.msra.gmra.mrb[8].mxu0 %vm691_vm10, %v1881_v23  ;;  %v2085_v19 = vpop.permute.xlu1 %1135 }
  0xd1   :  { %1588 = vmatprep.mubr.msk.bf16.mxu0 %vm1358_vm11, %v2029_v15 }
 0x181   :  { %v748_v24 = vpop.f32.mrb[0].mxu0 }
 0x182   :  { %v843_v25 = vmax.f32 %v748_v24, 0.0  ;;  %v750_v27 = vpop.f32.mrb[1].mxu0 }
 0x183   :  { %v844_v28 = vmax.f32 %v750_v27, 0.0  ;;  %v752_v30 = vpop.f32.mrb[2].mxu0 }
 0x184   :  { %v849_v23 = vmax.f32 %v752_v30, 0.0  ;;  %v754_v31 = vpop.f32.mrb[3].mxu0  ;;  %v887_v32 = vmul.f32 %v860_v26, %v843_v25 }
 0x185   :  { %v850_v10 = vmax.f32 %v754_v31, 0.0  ;;  %v888_v34 = vmul.f32 %v864_v29, %v844_v28 }
 0x186   :  { %v893_v33 = vmul.f32 %v860_v26, %v849_v23 }
 0x187   :  { %v894_v35 = vmul.f32 %v864_v29, %v850_v10 }
 0x188   :  { %v1946_v36 = vpack.c.bf16 %v893_v33, %v887_v32 }
 0x189   :  { %v1948_v37 = vpack.c.bf16 %v894_v35, %v888_v34 }
 0x18a   :  { %975 = vrot.lane.b32.xlu1 %v1946_v36, %s1668_s0  ;;  %929 = vrot.lane.b32.xlu0 %v1946_v36, %s1669_s23 }
 0x18e   :  { %1067 = vrot.lane.b32.xlu1 %v1946_v36, %s1670_s24  ;;  %1021 = vrot.lane.b32.xlu0 %v1946_v36, %s1671_s25 }
 0x192   :  { %1169 = vrot.lane.b32.xlu1 %v1946_v36, %s1673_s27  ;;  %1123 = vrot.lane.b32.xlu0 %v1946_v36, %s1672_s26 }
 0x193   :  { %v791_v41 = vpop.f32.mrb[4].mxu0 }
 0x194   :  { %v845_v43 = vmax.f32 %v791_v41, 0.0  ;;  %v793_v44 = vpop.f32.mrb[5].mxu0 }
 0x195   :  { %v846_v45 = vmax.f32 %v793_v44, 0.0  ;;  %v795_v46 = vpop.f32.mrb[6].mxu0 }
 0x196   :  { %1261 = vrot.lane.b32.xlu1 %v1946_v36, %s1675_s29  ;;  %1215 = vrot.lane.b32.xlu0 %v1946_v36, %s1674_s28  ;;  %v889_v47 = vmul.f32 %v868_v40, %v845_v43  ;;  %v851_v48 = vmax.f32 %v795_v46, 0.0  ;;  %v797_v50 = vpop.f32.mrb[7].mxu0 }
 0x197   :  { %v890_v51 = vmul.f32 %v872_v42, %v846_v45  ;;  %v852_v52 = vmax.f32 %v797_v50, 0.0 }
 0x198   :  { %v895_v53 = vmul.f32 %v868_v40, %v851_v48 }
 0x199   :  { %v896_v54 = vmul.f32 %v872_v42, %v852_v52 }
 0x19a   :  { %977 = vrot.lane.b32.xlu0 %v1948_v37, %s1668_s0  ;;  %931 = vrot.lane.b32.xlu1 %v1948_v37, %s1669_s23  ;;  %v1976_v55 = vpack.c.bf16 %v895_v53, %v889_v47 }
 0x19b   :  { %v1978_v56 = vpack.c.bf16 %v896_v54, %v890_v51 }
 0x19e   :  { %1069 = vrot.lane.b32.xlu0 %v1948_v37, %s1670_s24  ;;  %1023 = vrot.lane.b32.xlu1 %v1948_v37, %s1671_s25 }
 0x1a2   :  { %1125 = vrot.lane.b32.xlu0 %v1948_v37, %s1672_s26  ;;  %1171 = vrot.lane.b32.xlu1 %v1948_v37, %s1673_s27 }
 0x1a3   :  { %v834_v60 = vpop.f32.mrb[8].mxu0 }
 0x1a4   :  { %v847_v62 = vmax.f32 %v834_v60, 0.0  ;;  %v836_v63 = vpop.f32.mrb[9].mxu0 }
 0x1a5   :  { %v848_v0 = vmax.f32 %v836_v63, 0.0  ;;  %v838_v1 = vpop.f32.mrb[10].mxu0 }
 0x1a6   :  { %1217 = vrot.lane.b32.xlu0 %v1948_v37, %s1674_s28  ;;  %1263 = vrot.lane.b32.xlu1 %v1948_v37, %s1675_s29  ;;  %v891_v2 = vmul.f32 %v876_v59, %v847_v62  ;;  %v853_v3 = vmax.f32 %v838_v1, 0.0  ;;  %v840_v4 = vpop.f32.mrb[11].mxu0 }
 0x1a7   :  { %v892_v6 = vmul.f32 %v880_v61, %v848_v0  ;;  %v854_v8 = vmax.f32 %v840_v4, 0.0 }
 0x1a8   :  { %v897_v5 = vmul.f32 %v876_v59, %v853_v3 }
 0x1a9   :  { %v898_v11 = vmul.f32 %v880_v61, %v854_v8 }
 0x1aa   :  { %1173 = vrot.lane.b32.xlu0 %v1976_v55, %s1673_s27  ;;  %1127 = vrot.lane.b32.xlu1 %v1976_v55, %s1672_s26  ;;  %v2002_v12 = vpack.c.bf16 %v897_v5, %v891_v2 }
 0x1ab   :  { %v2004_v13 = vpack.c.bf16 %v898_v11, %v892_v6 }
 0x1ae   :  { %1265 = vrot.lane.b32.xlu0 %v1976_v55, %s1675_s29  ;;  %1219 = vrot.lane.b32.xlu1 %v1976_v55, %s1674_s28 }
 0x1b2   :  { %933 = vrot.lane.b32.xlu0 %v1976_v55, %s1669_s23  ;;  %935 = vrot.lane.b32.xlu1 %v1978_v56, %s1669_s23 }
 0x1b6   :  { %979 = vrot.lane.b32.xlu0 %v1976_v55, %s1668_s0  ;;  %981 = vrot.lane.b32.xlu1 %v1978_v56, %s1668_s0 }
 0x1ba   :  { %1025 = vrot.lane.b32.xlu0 %v1976_v55, %s1671_s25  ;;  %1027 = vrot.lane.b32.xlu1 %v1978_v56, %s1671_s25 }
 0x1be   :  { %1071 = vrot.lane.b32.xlu0 %v1976_v55, %s1670_s24  ;;  %1073 = vrot.lane.b32.xlu1 %v1978_v56, %s1670_s24 }
 0x1c2   :  { %1129 = vrot.lane.b32.xlu0 %v1978_v56, %s1672_s26  ;;  %1131 = vrot.lane.b32.xlu1 %v2002_v12, %s1672_s26 }
 0x1c6   :  { %1175 = vrot.lane.b32.xlu0 %v1978_v56, %s1673_s27  ;;  %1177 = vrot.lane.b32.xlu1 %v2002_v12, %s1673_s27 }
 0x1ca   :  { %937 = vrot.lane.b32.xlu0 %v2002_v12, %s1669_s23  ;;  %939 = vrot.lane.b32.xlu1 %v2004_v13, %s1669_s23 }
 0x1ce   :  { %983 = vrot.lane.b32.xlu0 %v2002_v12, %s1668_s0  ;;  %985 = vrot.lane.b32.xlu1 %v2004_v13, %s1668_s0 }
 0x1d2   :  { %1029 = vrot.lane.b32.xlu0 %v2002_v12, %s1671_s25  ;;  %1031 = vrot.lane.b32.xlu1 %v2004_v13, %s1671_s25 }
 0x1d6   :  { %1075 = vrot.lane.b32.xlu0 %v2002_v12, %s1670_s24  ;;  %1077 = vrot.lane.b32.xlu1 %v2004_v13, %s1670_s24 }
 0x1da   :  { %1221 = vrot.lane.b32.xlu0 %v1978_v56, %s1674_s28  ;;  %1181 = vrot.lane.b32.xlu1 %v1676_v49, %s1673_s27 }
 0x1de   :  { %1267 = vrot.lane.b32.xlu0 %v1978_v56, %s1675_s29  ;;  %1223 = vrot.lane.b32.xlu1 %v2002_v12, %s1674_s28 }
 0x1e2   :  { %1133 = vrot.lane.b32.xlu0 %v2004_v13, %s1672_s26  ;;  %1227 = vrot.lane.b32.xlu1 %v1676_v49, %s1674_s28 }
 0x1e6   :  { %1179 = vrot.lane.b32.xlu0 %v2004_v13, %s1673_s27  ;;  %1269 = vrot.lane.b32.xlu1 %v2002_v12, %s1675_s29 }
 0x1ea   :  { %1225 = vrot.lane.b32.xlu0 %v2004_v13, %s1674_s28  ;;  %1273 = vrot.lane.b32.xlu1 %v1676_v49, %s1675_s29 }
 0x1ee   :  { %1271 = vrot.lane.b32.xlu0 %v2004_v13, %s1675_s29 }
 0x1fc   :  { %v976_v7 = vpop.permute.xlu1 %975  ;;  %v930_v24 = vpop.permute.xlu0 %929 }
 0x1fd   :  { %v941_v10 = vsel %vm137_vm2, %v928_v18, %v930_v24  ;;  %v987_v35 = vsel %vm196_vm1, %v974_v16, %v976_v7 }
 0x200   :  { %v1068_v25 = vpop.permute.xlu1 %1067  ;;  %v1022_v26 = vpop.permute.xlu0 %1021 }
 0x201   :  { %v1033_v43 = vsel %vm255_vm3, %v1020_v20, %v1022_v26  ;;  %v1079_v47 = vsel %vm314_vm4, %v1066_v17, %v1068_v25 }
 0x204   :  { %v1170_v27 = vpop.permute.xlu1 %1169  ;;  %v1124_v28 = vpop.permute.xlu0 %1123 }
 0x208   :  { %v2087_v29 = vpop.permute.xlu1 %1261  ;;  %v1216_v30 = vpop.permute.xlu0 %1215 }
 0x20c   :  { %v932_v23 = vpop.permute.xlu1 %931  ;;  %v978_v49 = vpop.permute.xlu0 %977 }
 0x20d   :  { %v942_v31 = vsel %vm137_vm2, %v930_v24, %v932_v23  ;;  %v988_v32 = vsel %vm196_vm1, %v976_v7, %v978_v49 }
 0x20e   :  { %1362 = vmatprep.subr.bf16.mxu1 %v942_v31 }
 0x20f   :  { %1363 = vmatpush1.bf16.msra.mxu1 %v941_v10 }
 0x210   :  { %v1024_v33 = vpop.permute.xlu1 %1023  ;;  %1364 = vmatprep.subr.bf16.mxu1 %v988_v32  ;;  %v1070_v34 = vpop.permute.xlu0 %1069 }
 0x211   :  { %v1034_v40 = vsel %vm255_vm3, %v1022_v26, %v1024_v33  ;;  %v1080_v44 = vsel %vm314_vm4, %v1068_v25, %v1070_v34 }
 0x213   :  { %1365 = vmatpush1.bf16.msra.mxu1 %v987_v35 }
 0x214   :  { %v1172_v41 = vpop.permute.xlu1 %1171  ;;  %1366 = vmatprep.subr.bf16.mxu1 %v1034_v40  ;;  %v1126_v42 = vpop.permute.xlu0 %1125 }
 0x215   :  { %v1137_v54 = vsel %vm405_vm6, %v1124_v28, %v1126_v42  ;;  %v1183_v62 = vsel %vm464_vm5, %v1170_v27, %v1172_v41 }
 0x217   :  { %1367 = vmatpush1.bf16.msra.mxu1 %v1033_v43 }
 0x218   :  { %v1264_v45 = vpop.permute.xlu1 %1263  ;;  %1368 = vmatprep.subr.bf16.mxu1 %v1080_v44  ;;  %v1218_v46 = vpop.permute.xlu0 %1217 }
 0x219   :  { %v1229_v4 = vsel %vm523_vm7, %v1216_v30, %v1218_v46  ;;  %v1275_v17 = vsel %vm582_vm8, %v2087_v29, %v1264_v45 }
 0x21b   :  { %1369 = vmatpush1.bf16.msra.mxu1 %v1079_v47 }
 0x21c   :  { %v1128_v48 = vpop.permute.xlu1 %1127  ;;  %1370 = vmatprep.subr.bf16.mxu1 %v1948_v37  ;;  %v2098_v50 = vpop.permute.xlu0 %1173 }
 0x21d   :  { %v1138_v51 = vsel %vm405_vm6, %v1126_v42, %v1128_v48  ;;  %v1184_v59 = vsel %vm464_vm5, %v1172_v41, %v2098_v50 }
 0x21f   :  { %1371 = vmatpush1.bf16.msra.mxu1 %v1946_v36 }
 0x220   :  { %v2102_v52 = vpop.permute.xlu1 %1219  ;;  %1372 = vmatprep.subr.bf16.mxu1 %v1138_v51  ;;  %v2104_v53 = vpop.permute.xlu0 %1265 }
 0x221   :  { %v1230_v63 = vsel %vm523_vm7, %v1218_v46, %v2102_v52  ;;  %v1276_v6 = vsel %vm582_vm8, %v1264_v45, %v2104_v53 }
 0x223   :  { %1373 = vmatpush1.bf16.msra.mxu1 %v1137_v54 }
 0x224   :  { %v936_v60 = vpop.permute.xlu1 %935  ;;  %1374 = vmatprep.subr.bf16.mxu1 %v1184_v59  ;;  %v934_v37 = vpop.permute.xlu0 %933 }
 0x225   :  { %v943_v61 = vsel %vm137_vm2, %v932_v23, %v934_v37  ;;  %v944_v36 = vsel %vm137_vm2, %v934_v37, %v936_v60 }
 0x226   :  { %1403 = vmatprep.subr.bf16.mxu0 %v944_v36 }
 0x227   :  { %1375 = vmatpush1.bf16.msra.mxu1 %v1183_v62  ;;  %1404 = vmatpush1.bf16.msra.mxu0 %v943_v61 }
 0x228   :  { %v982_v0 = vpop.permute.xlu1 %981  ;;  %1376 = vmatprep.subr.bf16.mxu1 %v1230_v63  ;;  %v980_v1 = vpop.permute.xlu0 %979 }
 0x229   :  { %v989_v2 = vsel %vm196_vm1, %v978_v49, %v980_v1  ;;  %v990_v3 = vsel %vm196_vm1, %v980_v1, %v982_v0 }
 0x22a   :  { %1405 = vmatprep.subr.bf16.mxu0 %v990_v3 }
 0x22b   :  { %1377 = vmatpush1.bf16.msra.mxu1 %v1229_v4  ;;  %1406 = vmatpush1.bf16.msra.mxu0 %v989_v2 }
 0x22c   :  { %v1028_v8 = vpop.permute.xlu1 %1027  ;;  %1378 = vmatprep.subr.bf16.mxu1 %v1276_v6  ;;  %v1026_v5 = vpop.permute.xlu0 %1025 }
 0x22d   :  { %v1035_v11 = vsel %vm255_vm3, %v1024_v33, %v1026_v5  ;;  %v1036_v16 = vsel %vm255_vm3, %v1026_v5, %v1028_v8  ;;  %v1485_v5 = vld [vmem:[%s2192_s3] sm:$0x3f]  ;;  %s1678_s3 = smov [#allocation6]  }
 0x22e   :  { %1407 = vmatprep.subr.bf16.mxu0 %v1036_v16  ;;  %v1494_v16 = vrot.slane %v1485_v5, %v863_v22  ;;  %s1546_s10 = sshll.u32 %s1678_s3, 4  ;;  %s1547_s10 = int_to_ptr.vmem [resolvable:$true] %s1546_s10 }
 0x22f   :  { %1379 = vmatpush1.bf16.msra.mxu1 %v1275_v17  ;;  %1408 = vmatpush1.bf16.msra.mxu0 %v1035_v11  ;;  %v1490_v11 = vrot.slane %v1485_v5, %v859_v21  ;;  %s1643_s11 = scalar_lea.vmem %s1547_s10, 512  ;;  %p1648_p1 = scmp.lt.s32.totalorder %s1547_s10, %s1547_s10 }
 0x230   :  { %v1074_v18 = vpop.permute.xlu1 %1073  ;;  %v1072_v20 = vpop.permute.xlu0 %1071  ;;  %p1644_p0 = scmp.ne.s32.totalorder %s1547_s10, %s1643_s11  ;;  %p1649_p2 = scmp.lt.s32.totalorder %s1643_s11, %s1643_s11 }
 0x231   :  { %v1081_v7 = vsel %vm314_vm4, %v1070_v34, %v1072_v20  ;;  %v1082_v24 = vsel %vm314_vm4, %v1072_v20, %v1074_v18 }
 0x232   :  { %1409 = vmatprep.subr.bf16.mxu0 %v1082_v24  ;;  %1395 = vmatmul.mubr.bf16.vlgmr.msra.gmra.mrb[0].mxu1 %v2025_v14  ;;  %p1650_p3 = por %p1649_p2, %p1648_p1 }
 0x233   :  { %1410 = vmatpush1.bf16.msra.mxu0 %v1081_v7  ;;  %1589 = vmatprep.mubr.msk.bf16.mxu1 %vm1358_vm11, %v2029_v15 }
 0x234   :  { %v1132_v25 = vpop.permute.xlu1 %1131  ;;  %1411 = vmatprep.subr.bf16.mxu0 %v1978_v56  ;;  %v1130_v26 = vpop.permute.xlu0 %1129  ;;  %p1651_p4 = pnand %p1650_p3, %p1644_p0 }
 0x235   :  { %v1140_v27 = vsel %vm405_vm6, %v1130_v26, %v1132_v25  ;;  %v1139_v30 = vsel %vm405_vm6, %v1128_v48, %v1130_v26  ;;  %v1498_v26 = vrot.slane %v1485_v5, %v867_v38 }
 0x237   :  { %1412 = vmatpush1.bf16.msra.mxu0 %v1976_v55 }
 0x238   :  { %v1178_v28 = vpop.permute.xlu1 %1177  ;;  %1413 = vmatprep.subr.bf16.mxu0 %v1140_v27  ;;  %v1176_v29 = vpop.permute.xlu0 %1175  ;;  %v1502_v27 = vrot.slane %v1485_v5, %v871_v39 }
 0x239   :  { %v1186_v23 = vsel %vm464_vm5, %v1176_v29, %v1178_v28  ;;  %v1185_v55 = vsel %vm464_vm5, %v2098_v50, %v1176_v29 }
 0x23b   :  { %1414 = vmatpush1.bf16.msra.mxu0 %v1139_v30 }
 0x23c   :  { %v940_v49 = vpop.permute.xlu1 %939  ;;  %1415 = vmatprep.subr.bf16.mxu0 %v1186_v23  ;;  %v938_v31 = vpop.permute.xlu0 %937 }
 0x23d   :  { %v945_v15 = vsel %vm137_vm2, %v936_v60, %v938_v31  ;;  %v946_v56 = vsel %vm137_vm2, %v938_v31, %v940_v49  ;;  %v1506_v31 = vrot.slane %v1485_v5, %v875_v57 }
 0x23e   :  { %1444 = vmatprep.subr.bf16.mxu1 %v946_v56 }
 0x23f   :  { %1416 = vmatpush1.bf16.msra.mxu0 %v1185_v55  ;;  %1445 = vmatpush1.bf16.msra.mxu1 %v945_v15  ;;  %v1510_v15 = vrot.slane %v1485_v5, %v879_v58 }
 0x240   :  { %v986_v10 = vpop.permute.xlu1 %985  ;;  %v984_v32 = vpop.permute.xlu0 %983 }
 0x241   :  { %v991_v33 = vsel %vm196_vm1, %v982_v0, %v984_v32  ;;  %v992_v34 = vsel %vm196_vm1, %v984_v32, %v986_v10 }
 0x242   :  { %1446 = vmatprep.subr.bf16.mxu1 %v992_v34 }
 0x243   :  { %1447 = vmatpush1.bf16.msra.mxu1 %v991_v33 }
 0x244   :  { %v1032_v35 = vpop.permute.xlu1 %1031  ;;  %v1030_v40 = vpop.permute.xlu0 %1029 }
 0x245   :  { %v1037_v41 = vsel %vm255_vm3, %v1028_v8, %v1030_v40  ;;  %v1038_v42 = vsel %vm255_vm3, %v1030_v40, %v1032_v35 }
 0x246   :  { %1448 = vmatprep.subr.bf16.mxu1 %v1038_v42 }
 0x247   :  { %1449 = vmatpush1.bf16.msra.mxu1 %v1037_v41 }
 0x248   :  { %v1078_v43 = vpop.permute.xlu1 %1077  ;;  %v1076_v44 = vpop.permute.xlu0 %1075 }
 0x249   :  { %v1083_v45 = vsel %vm314_vm4, %v1074_v18, %v1076_v44  ;;  %v1084_v46 = vsel %vm314_vm4, %v1076_v44, %v1078_v43 }
 0x24a   :  { %1450 = vmatprep.subr.bf16.mxu1 %v1084_v46 }
 0x24b   :  { %1451 = vmatpush1.bf16.msra.mxu1 %v1083_v45 }
 0x24c   :  { %v1182_v47 = vpop.permute.xlu1 %1181  ;;  %1452 = vmatprep.subr.bf16.mxu1 %v2004_v13  ;;  %v1222_v48 = vpop.permute.xlu0 %1221 }
 0x24d   :  { %v1231_v59 = vsel %vm523_vm7, %v2102_v52, %v1222_v48 }
 0x24f   :  { %1453 = vmatpush1.bf16.msra.mxu1 %v2002_v12 }
 0x250   :  { %v1224_v50 = vpop.permute.xlu1 %1223  ;;  %v1268_v51 = vpop.permute.xlu0 %1267 }
 0x251   :  { %v1232_v54 = vsel %vm523_vm7, %v1222_v48, %v1224_v50  ;;  %v1277_v52 = vsel %vm582_vm8, %v2104_v53, %v1268_v51  ;;  %v1677_v53 = vmov 0.0  }
 0x252   :  { %1417 = vmatprep.subr.bf16.mxu0 %v1232_v54  ;;  %1523 = vst [vmem:[#allocation6] sm:$0xf] %v1677_v53  ;;  %1524 = vst [vmem:[#allocation6 + $0x1c] sm:$0xf] %v1677_v53 }
 0x253   :  { %1418 = vmatpush1.bf16.msra.mxu0 %v1231_v59 }
 0x254   :  { %v1228_v60 = vpop.permute.xlu1 %1227  ;;  %v1134_v37 = vpop.permute.xlu0 %1133 }
 0x255   :  { %v1141_v61 = vsel %vm405_vm6, %v1132_v25, %v1134_v37  ;;  %v1142_v36 = vsel %vm405_vm6, %v1134_v37, %v2085_v19 }
 0x256   :  { %1454 = vmatprep.subr.bf16.mxu1 %v1142_v36 }
 0x257   :  { %1455 = vmatpush1.bf16.msra.mxu1 %v1141_v61 }
 0x258   :  { %v1270_v13 = vpop.permute.xlu1 %1269  ;;  %v1180_v12 = vpop.permute.xlu0 %1179 }
 0x259   :  { %v1187_v62 = vsel %vm464_vm5, %v1178_v28, %v1180_v12  ;;  %v1278_v63 = vsel %vm582_vm8, %v1268_v51, %v1270_v13  ;;  %v1188_v0 = vsel %vm464_vm5, %v1180_v12, %v1182_v47 }
 0x25a   :  { %1419 = vmatprep.subr.bf16.mxu0 %v1278_v63  ;;  %1456 = vmatprep.subr.bf16.mxu1 %v1188_v0 }
 0x25b   :  { %1420 = vmatpush1.bf16.msra.mxu0 %v1277_v52  ;;  %1457 = vmatpush1.bf16.msra.mxu1 %v1187_v62 }
 0x25c   :  { %v1226_v1 = vpop.permute.xlu0 %1225  ;;  %v1274_v3 = vpop.permute.xlu1 %1273 }
 0x25d   :  { %v1233_v19 = vsel %vm523_vm7, %v1224_v50, %v1226_v1  ;;  %v1234_v2 = vsel %vm523_vm7, %v1226_v1, %v1228_v60 }
 0x25e   :  { %1458 = vmatprep.subr.bf16.mxu1 %v1234_v2  ;;  %1436 = vmatmul.mubr.bf16.vlgmr.msra.gmra.mrb[12].mxu0 %v2025_v14 }
 0x25f   :  { %1459 = vmatpush1.bf16.msra.mxu1 %v1233_v19 }
 0x260   :  { %v1272_v4 = vpop.permute.xlu0 %1271 }
 0x261   :  { %v1279_v6 = vsel %vm582_vm8, %v1270_v13, %v1272_v4  ;;  %v1280_v8 = vsel %vm582_vm8, %v1272_v4, %v1274_v3 }
 0x262   :  { %1460 = vmatprep.subr.bf16.mxu1 %v1280_v8 }
 0x263   :  { %1461 = vmatpush1.bf16.msra.mxu1 %v1279_v6 }
 0x266   :  { %1477 = vmatmul.mubr.bf16.vlgmr.msra.gmra.mrb[4].mxu1 %v2025_v14 }
 0x305   :  { %v1396_v17 = vpop.f32.mrb[0].mxu1 }
 0x306   :  { %v1517_v18 = vmul.f32 %v1490_v11, %v1396_v17  ;;  %v1398_v20 = vpop.f32.mrb[1].mxu1 }
 0x307   :  { %v1518_v7 = vmul.f32 %v1494_v16, %v1398_v20  ;;  %v1400_v24 = vpop.f32.mrb[2].mxu1 }
 0x308   :  { %v1401_v25 = vpop.f32.mrb[3].mxu1 }
 0x309   :  { %v1531_v14 = vcombine.low %v1517_v18, %v1518_v7 }
 0x30b   :  { %1537 = vst [vmem:[#allocation6 + $0x4] sm:$0xff] %v1531_v14 }
 0x331   :  { %v1437_v28 = vpop.f32.mrb[12].mxu0 }
 0x332   :  { %v1519_v29 = vmul.f32 %v1498_v26, %v1437_v28  ;;  %v1439_v21 = vpop.f32.mrb[13].mxu0 }
 0x333   :  { %v1520_v30 = vmul.f32 %v1502_v27, %v1439_v21  ;;  %v1441_v23 = vpop.f32.mrb[14].mxu0 }
 0x334   :  { %v1442_v22 = vpop.f32.mrb[15].mxu0 }
 0x335   :  { %v1532_v49 = vcombine.low %v1519_v29, %v1520_v30 }
 0x337   :  { %1538 = vst [vmem:[#allocation6 + $0xc] sm:$0xff] %v1532_v49 }
 0x339   :  { %v1478_v56 = vpop.f32.mrb[4].mxu1 }
 0x33a   :  { %v1521_v55 = vmul.f32 %v1506_v31, %v1478_v56  ;;  %v1480_v38 = vpop.f32.mrb[5].mxu1 }
 0x33b   :  { %v1522_v39 = vmul.f32 %v1510_v15, %v1480_v38  ;;  %v1482_v10 = vpop.f32.mrb[6].mxu1 }
 0x33c   :  { %v1483_v32 = vpop.f32.mrb[7].mxu1 }
 0x33d   :  { %v1533_v33 = vcombine.low %v1521_v55, %v1522_v39 }
 0x33f   :  { %1539 = vst [vmem:[#allocation6 + $0x14] sm:$0xff] %v1533_v33 }
 0x340   :  { %1654 = shalt.err (!%p1651_p4)
}
 0x341   :  { %s1655_s14 = scalar_lea.hbm %s2193_s4, 512 }
 0x342   :  { %p1656_p5 = scmp.ne.s32.totalorder %s2193_s4, %s1655_s14  ;;  %p1659_p6 = scmp.lt.u32.totalorder %s1655_s14, %s2193_s4 }
 0x344   :  { %p1661_p7 = pnand %p1659_p6, %p1656_p5 }
 0x346   :  { %1664 = shalt.err (!%p1661_p7)
}
 0x347   :  { %1549 = dma.vmem_to_hbm [thread:$0]  %s1547_s10, 512, %s2193_s4, [#allocation7]  }
 0x348   :  { %1665 = dma.done.wait [#allocation7], 512  }
 0x349   :  { %1666 = vsyncadd [#allocation7], 4294966784 }
 0x34a   :  { %1553 = vsyncpa [#allocation7], 1 }

</bundles_post_ra>
